<compile_context>
chip_gen: v5e
topology: v5e:2x2
jax: 0.10.0
libtpu: 0.0.40
codegen_flags: <defaults>
</compile_context>

<pallas_src>
import math

import jax
import jax.numpy as jnp
import numpy as np
from jax.experimental import pallas as pl
from jax.experimental.pallas import tpu as pltpu


def _make_karras_kernel(num_channels: int, s_noise: float):
    C = num_channels

    def kernel(sigmas_ref, gammas_ref,        # SMEM scalar-prefetch
               noise_ref, eps_ref, wb_ref,    # VMEM inputs
               x_ref):                        # VMEM output, resident across grid
        i = pl.program_id(0)

        # ---- x_0 = sigmas[0] * noise (first grid step only) -----------------
        @pl.when(i == 0)
        def _():
            x_ref[...] = sigmas_ref[0] * noise_ref[...]

        sigma = sigmas_ref[i]
        sigma_next = sigmas_ref[i + 1]
        gamma = gammas_ref[i]
        sigma_hat = sigma + gamma * sigma

        # synthetic denoiser fn(x, sigma) = tanh(W @ x + b + sigma)
        # C is tiny -> unrolled VPU FMAs, bias folded into last column of wb.
        wb = wb_ref[...]                                  # (C, C+1)
        w_cols = [wb[:, k:k + 1] for k in range(C)]       # each (C, 1)
        b_col = wb[:, C:C + 1]                            # (C, 1)

        def net(xv, sig):
            acc = w_cols[0] * xv[0:1, :]
            for k in range(1, C):
                acc = acc + w_cols[k] * xv[k:k + 1, :]
            return jnp.tanh(acc + (b_col + sig))

        # ---- Karras Algorithm 2, one step ------------------------------------
        x = x_ref[...]                                    # (C, B*T)
        churn = jnp.sqrt(sigma_hat * sigma_hat - sigma * sigma)
        x_hat = x + (s_noise * churn) * eps_ref[...]
        d = (x_hat - net(x_hat, sigma_hat)) / sigma_hat
        x_euler = x_hat + (sigma_next - sigma_hat) * d

        @pl.when(sigma_next != 0.0)                       # Heun (2nd-order) correction
        def _():
            d_prime = (x_euler - net(x_euler, sigma_next)) / sigma_next
            x_ref[...] = x_hat + 0.5 * (sigma - sigma_hat) * (d + d_prime)

        @pl.when(sigma_next == 0.0)
        def _():
            x_ref[...] = x_euler

    return kernel


def karras_sample(noise, sigmas, epsilons, wb, *,
                  s_tmin=0.0, s_tmax=float("inf"), s_churn=0.0, s_noise=1.0):
    """KarrasSampler.forward: iterate Algorithm 2 over the sigma schedule."""
    B, C, T = noise.shape
    L = B * T
    num_steps = int(sigmas.shape[0])
    assert epsilons.shape == (num_steps - 1, B, C, T)

    # Lane-dense layout: fuse the batch onto the lane axis -> (C, B*T).
    noise2d = jnp.transpose(noise, (1, 0, 2)).reshape(C, L)
    eps2d = jnp.transpose(epsilons, (0, 2, 1, 3)).reshape(num_steps - 1, C, L)

    gamma_val = min(s_churn / num_steps, math.sqrt(2.0) - 1.0)
    gammas = jnp.where((sigmas >= s_tmin) & (sigmas <= s_tmax),
                       gamma_val, 0.0).astype(jnp.float32)

    grid_spec = pltpu.PrefetchScalarGridSpec(
        num_scalar_prefetch=2,                    # sigmas, gammas -> SMEM
        grid=(num_steps - 1,),
        in_specs=[
            pl.BlockSpec((C, L), lambda i, sig, gam: (0, 0)),            # noise (step 0)
            pl.BlockSpec((None, C, L), lambda i, sig, gam: (i, 0, 0)),   # epsilon_i
            pl.BlockSpec((C, C + 1), lambda i, sig, gam: (0, 0)),        # [W | b]
        ],
        out_specs=pl.BlockSpec((C, L), lambda i, sig, gam: (0, 0)),      # resident x
    )

    x2d = pl.pallas_call(
        _make_karras_kernel(C, float(s_noise)),
        out_shape=jax.ShapeDtypeStruct((C, L), jnp.float32),
        grid_spec=grid_spec,
        compiler_params=pltpu.CompilerParams(
            dimension_semantics=("arbitrary",)),   # steps are a recurrence
    )(sigmas.astype(jnp.float32), gammas, noise2d, eps2d, wb)

    # back to PyTorch's (B, C, T) convention
    return jnp.transpose(x2d.reshape(C, B, T), (1, 0, 2))


def karras_reference(noise, sigmas, epsilons, wb, *,
                     s_tmin=0.0, s_tmax=float("inf"), s_churn=0.0, s_noise=1.0):
    """Pure-JAX reference mirroring KarrasSampler.forward / .step."""
    B, C, T = noise.shape
    num_steps = int(sigmas.shape[0])
    W, b = wb[:, :C], wb[:, C:]

    def fn(xb, sigma):
        h = jnp.einsum("ck,bkt->bct", W, xb) + b[None, :, :] + sigma
        return jnp.tanh(h)

    sig = np.asarray(sigmas, dtype=np.float64)
    gamma_val = min(s_churn / num_steps, math.sqrt(2.0) - 1.0)

    x = sigmas[0] * noise
    for i in range(num_steps - 1):
        sigma, sigma_next = float(sig[i]), float(sig[i + 1])
        gamma = gamma_val if (s_tmin <= sigma <= s_tmax) else 0.0
        sigma_hat = sigma + gamma * sigma
        eps = s_noise * epsilons[i]
        x_hat = x + math.sqrt(sigma_hat ** 2 - sigma ** 2) * eps
        d = (x_hat - fn(x_hat, sigma_hat)) / sigma_hat
        x_next = x_hat + (sigma_next - sigma_hat) * d
        if sigma_next != 0.0:
            d_prime = (x_next - fn(x_next, sigma_next)) / sigma_next
            x_next = x_hat + 0.5 * (sigma - sigma_hat) * (d + d_prime)
        x = x_next
    return x


if __name__ == "__main__":
    B, C, T = 2, 4, 64              # batch fused on lanes -> B*T = 128 lanes
    num_steps = 5

    s_tmin, s_tmax = 0.5, 20.0      # last non-zero sigma (0.3) gets gamma = 0
    s_churn, s_noise = 40.0, 1.0

    key = jax.random.PRNGKey(0)
    kn, ke, kw, kb = jax.random.split(key, 4)

    noise = jax.random.normal(kn, (B, C, T), dtype=jnp.float32)
    epsilons = jax.random.normal(ke, (num_steps - 1, B, C, T), dtype=jnp.float32)
    sigmas = jnp.array([10.0, 3.0, 1.0, 0.3, 0.0], dtype=jnp.float32)

    # deterministic synthetic denoiser parameters, bias folded into the weight tile
    w = jax.random.normal(kw, (C, C), dtype=jnp.float32) * 0.3
    bias = jax.random.normal(kb, (C, 1), dtype=jnp.float32) * 0.1
    wb = jnp.concatenate([w, bias], axis=1)          # (C, C+1)

    x = karras_sample(noise, sigmas, epsilons, wb,
                      s_tmin=s_tmin, s_tmax=s_tmax, s_churn=s_churn, s_noise=s_noise)
    x = jax.block_until_ready(x)

    ref = karras_reference(noise, sigmas, epsilons, wb,
                           s_tmin=s_tmin, s_tmax=s_tmax, s_churn=s_churn, s_noise=s_noise)
    np.testing.assert_allclose(np.asarray(x), np.asarray(ref), rtol=1e-4, atol=1e-4)

    print("KERNEL_OK")
</pallas_src>

<mosaic_0001>
module attributes {stable_mosaic.version = 11 : i64} {
  func.func @kernel(%arg0: i32, %arg1: memref<5xf32, #tpu.memory_space<smem>>, %arg2: memref<5xf32, #tpu.memory_space<smem>>, %arg3: memref<4x128xf32, #tpu.memory_space<vmem>>, %arg4: memref<1x4x128xf32, #tpu.memory_space<vmem>>, %arg5: memref<4x5xf32, #tpu.memory_space<vmem>>, %arg6: memref<4x128xf32, #tpu.memory_space<vmem>>) attributes {dimension_semantics = [#tpu.dimension_semantics<arbitrary>], iteration_bounds = array<i64: 4>, scalar_prefetch = 2 : i64, scratch_operands = 0 : i64, tpu.core_type = #tpu.core_type<tc>, window_params = [{pipeline_mode = #tpu.pipeline_mode<synchronous>, transform_indices = @transform_0, window_bounds = array<i64: 4, 128>}, {transform_indices = @transform_1, window_bounds = array<i64: 1, 4, 128>}, {pipeline_mode = #tpu.pipeline_mode<synchronous>, transform_indices = @transform_2, window_bounds = array<i64: 4, 5>}, {pipeline_mode = #tpu.pipeline_mode<synchronous>, transform_indices = @transform_3, window_bounds = array<i64: 4, 128>}]} {
    %c0_i32 = arith.constant 0 : i32
    %0 = arith.cmpi eq, %arg0, %c0_i32 : i32
    %1 = arith.extui %0 : i1 to i32
    %c0_i32_0 = arith.constant 0 : i32
    %2 = arith.cmpi ne, %1, %c0_i32_0 : i32
    scf.if %2 {
      %c0_11 = arith.constant 0 : index
      %66 = memref.load %arg1[%c0_11] : memref<5xf32, #tpu.memory_space<smem>>
      %c0_12 = arith.constant 0 : index
      %c0_13 = arith.constant 0 : index
      %67 = vector.load %arg3[%c0_12, %c0_13] : memref<4x128xf32, #tpu.memory_space<vmem>>, vector<4x128xf32>
      %68 = vector.broadcast %66 : f32 to vector<4x128xf32>
      %69 = arith.mulf %68, %67 : vector<4x128xf32>
      %c0_14 = arith.constant 0 : index
      %c0_15 = arith.constant 0 : index
      %70 = vector.load %arg6[%c0_14, %c0_15] : memref<4x128xf32, #tpu.memory_space<vmem>>, vector<4x128xf32>
      tpu.vector_store %arg6[%c0_14, %c0_15], %69 {strides = array<i32>} : memref<4x128xf32, #tpu.memory_space<vmem>>, vector<4x128xf32>,
    } else {
    }
    %3 = arith.index_cast %arg0 : i32 to index
    %4 = memref.load %arg1[%3] : memref<5xf32, #tpu.memory_space<smem>>
    %c1_i32 = arith.constant 1 : i32
    %5 = arith.addi %arg0, %c1_i32 : i32
    %6 = arith.index_cast %5 : i32 to index
    %7 = memref.load %arg1[%6] : memref<5xf32, #tpu.memory_space<smem>>
    %8 = arith.index_cast %arg0 : i32 to index
    %9 = memref.load %arg2[%8] : memref<5xf32, #tpu.memory_space<smem>>
    %10 = arith.mulf %9, %4 : f32
    %11 = arith.addf %4, %10 : f32
    %c0 = arith.constant 0 : index
    %c0_1 = arith.constant 0 : index
    %12 = vector.load %arg5[%c0, %c0_1] : memref<4x5xf32, #tpu.memory_space<vmem>>, vector<4x5xf32>
    %13 = vector.extract_strided_slice %12 {offsets = [0, 0], sizes = [4, 1], strides = [1, 1]} : vector<4x5xf32> to vector<4x1xf32>
    %14 = vector.extract_strided_slice %12 {offsets = [0, 1], sizes = [4, 1], strides = [1, 1]} : vector<4x5xf32> to vector<4x1xf32>
    %15 = vector.extract_strided_slice %12 {offsets = [0, 2], sizes = [4, 1], strides = [1, 1]} : vector<4x5xf32> to vector<4x1xf32>
    %16 = vector.extract_strided_slice %12 {offsets = [0, 3], sizes = [4, 1], strides = [1, 1]} : vector<4x5xf32> to vector<4x1xf32>
    %17 = vector.extract_strided_slice %12 {offsets = [0, 4], sizes = [4, 1], strides = [1, 1]} : vector<4x5xf32> to vector<4x1xf32>
    %c0_2 = arith.constant 0 : index
    %c0_3 = arith.constant 0 : index
    %18 = vector.load %arg6[%c0_2, %c0_3] : memref<4x128xf32, #tpu.memory_space<vmem>>, vector<4x128xf32>
    %19 = arith.mulf %11, %11 : f32
    %20 = arith.mulf %4, %4 : f32
    %21 = arith.subf %19, %20 : f32
    %22 = math.sqrt %21 : f32
    %cst = arith.constant 1.000000e+00 : f32
    %23 = arith.mulf %cst, %22 : f32
    %c0_4 = arith.constant 0 : index
    %c0_5 = arith.constant 0 : index
    %c0_6 = arith.constant 0 : index
    %24 = vector.load %arg4[%c0_4, %c0_5, %c0_6] : memref<1x4x128xf32, #tpu.memory_space<vmem>>, vector<1x4x128xf32>
    %25 = vector.shape_cast %24 : vector<1x4x128xf32> to vector<4x128xf32>
    %26 = vector.broadcast %23 : f32 to vector<4x128xf32>
    %27 = arith.mulf %26, %25 : vector<4x128xf32>
    %28 = arith.addf %18, %27 : vector<4x128xf32>
    %29 = vector.extract_strided_slice %28 {offsets = [0, 0], sizes = [1, 128], strides = [1, 1]} : vector<4x128xf32> to vector<1x128xf32>
    %30 = vector.broadcast %13 : vector<4x1xf32> to vector<4x128xf32>
    %31 = vector.broadcast %29 : vector<1x128xf32> to vector<4x128xf32>
    %32 = arith.mulf %30, %31 : vector<4x128xf32>
    %33 = vector.extract_strided_slice %28 {offsets = [1, 0], sizes = [1, 128], strides = [1, 1]} : vector<4x128xf32> to vector<1x128xf32>
    %34 = vector.broadcast %14 : vector<4x1xf32> to vector<4x128xf32>
    %35 = vector.broadcast %33 : vector<1x128xf32> to vector<4x128xf32>
    %36 = arith.mulf %34, %35 : vector<4x128xf32>
    %37 = arith.addf %32, %36 : vector<4x128xf32>
    %38 = vector.extract_strided_slice %28 {offsets = [2, 0], sizes = [1, 128], strides = [1, 1]} : vector<4x128xf32> to vector<1x128xf32>
    %39 = vector.broadcast %15 : vector<4x1xf32> to vector<4x128xf32>
    %40 = vector.broadcast %38 : vector<1x128xf32> to vector<4x128xf32>
    %41 = arith.mulf %39, %40 : vector<4x128xf32>
    %42 = arith.addf %37, %41 : vector<4x128xf32>
    %43 = vector.extract_strided_slice %28 {offsets = [3, 0], sizes = [1, 128], strides = [1, 1]} : vector<4x128xf32> to vector<1x128xf32>
    %44 = vector.broadcast %16 : vector<4x1xf32> to vector<4x128xf32>
    %45 = vector.broadcast %43 : vector<1x128xf32> to vector<4x128xf32>
    %46 = arith.mulf %44, %45 : vector<4x128xf32>
    %47 = arith.addf %42, %46 : vector<4x128xf32>
    %48 = vector.broadcast %11 : f32 to vector<4x1xf32>
    %49 = arith.addf %17, %48 : vector<4x1xf32>
    %50 = vector.broadcast %49 : vector<4x1xf32> to vector<4x128xf32>
    %51 = arith.addf %47, %50 : vector<4x128xf32>
    %52 = math.tanh %51 : vector<4x128xf32>
    %53 = arith.subf %28, %52 : vector<4x128xf32>
    %54 = vector.broadcast %11 : f32 to vector<4x128xf32>
    %55 = arith.divf %53, %54 : vector<4x128xf32>
    %56 = arith.subf %7, %11 : f32
    %57 = vector.broadcast %56 : f32 to vector<4x128xf32>
    %58 = arith.mulf %57, %55 : vector<4x128xf32>
    %59 = arith.addf %28, %58 : vector<4x128xf32>
    %cst_7 = arith.constant 0.000000e+00 : f32
    %60 = arith.cmpf one, %7, %cst_7 : f32
    %61 = arith.extui %60 : i1 to i32
    %c0_i32_8 = arith.constant 0 : i32
    %62 = arith.cmpi ne, %61, %c0_i32_8 : i32
    scf.if %62 {
      %66 = vector.extract_strided_slice %59 {offsets = [0, 0], sizes = [1, 128], strides = [1, 1]} : vector<4x128xf32> to vector<1x128xf32>
      %67 = vector.broadcast %13 : vector<4x1xf32> to vector<4x128xf32>
      %68 = vector.broadcast %66 : vector<1x128xf32> to vector<4x128xf32>
      %69 = arith.mulf %67, %68 : vector<4x128xf32>
      %70 = vector.extract_strided_slice %59 {offsets = [1, 0], sizes = [1, 128], strides = [1, 1]} : vector<4x128xf32> to vector<1x128xf32>
      %71 = vector.broadcast %14 : vector<4x1xf32> to vector<4x128xf32>
      %72 = vector.broadcast %70 : vector<1x128xf32> to vector<4x128xf32>
      %73 = arith.mulf %71, %72 : vector<4x128xf32>
      %74 = arith.addf %69, %73 : vector<4x128xf32>
      %75 = vector.extract_strided_slice %59 {offsets = [2, 0], sizes = [1, 128], strides = [1, 1]} : vector<4x128xf32> to vector<1x128xf32>
      %76 = vector.broadcast %15 : vector<4x1xf32> to vector<4x128xf32>
      %77 = vector.broadcast %75 : vector<1x128xf32> to vector<4x128xf32>
      %78 = arith.mulf %76, %77 : vector<4x128xf32>
      %79 = arith.addf %74, %78 : vector<4x128xf32>
      %80 = vector.extract_strided_slice %59 {offsets = [3, 0], sizes = [1, 128], strides = [1, 1]} : vector<4x128xf32> to vector<1x128xf32>
      %81 = vector.broadcast %16 : vector<4x1xf32> to vector<4x128xf32>
      %82 = vector.broadcast %80 : vector<1x128xf32> to vector<4x128xf32>
      %83 = arith.mulf %81, %82 : vector<4x128xf32>
      %84 = arith.addf %79, %83 : vector<4x128xf32>
      %85 = vector.broadcast %7 : f32 to vector<4x1xf32>
      %86 = arith.addf %17, %85 : vector<4x1xf32>
      %87 = vector.broadcast %86 : vector<4x1xf32> to vector<4x128xf32>
      %88 = arith.addf %84, %87 : vector<4x128xf32>
      %89 = math.tanh %88 : vector<4x128xf32>
      %90 = arith.subf %59, %89 : vector<4x128xf32>
      %91 = vector.broadcast %7 : f32 to vector<4x128xf32>
      %92 = arith.divf %90, %91 : vector<4x128xf32>
      %93 = arith.subf %4, %11 : f32
      %cst_11 = arith.constant 5.000000e-01 : f32
      %94 = arith.mulf %cst_11, %93 : f32
      %95 = arith.addf %55, %92 : vector<4x128xf32>
      %96 = vector.broadcast %94 : f32 to vector<4x128xf32>
      %97 = arith.mulf %96, %95 : vector<4x128xf32>
      %98 = arith.addf %28, %97 : vector<4x128xf32>
      %c0_12 = arith.constant 0 : index
      %c0_13 = arith.constant 0 : index
      %99 = vector.load %arg6[%c0_12, %c0_13] : memref<4x128xf32, #tpu.memory_space<vmem>>, vector<4x128xf32>
      tpu.vector_store %arg6[%c0_12, %c0_13], %98 {strides = array<i32>} : memref<4x128xf32, #tpu.memory_space<vmem>>, vector<4x128xf32>,
    } else {
    }
    %cst_9 = arith.constant 0.000000e+00 : f32
    %63 = arith.cmpf oeq, %7, %cst_9 : f32
    %64 = arith.extui %63 : i1 to i32
    %c0_i32_10 = arith.constant 0 : i32
    %65 = arith.cmpi ne, %64, %c0_i32_10 : i32
    scf.if %65 {
      %c0_11 = arith.constant 0 : index
      %c0_12 = arith.constant 0 : index
      %66 = vector.load %arg6[%c0_11, %c0_12] : memref<4x128xf32, #tpu.memory_space<vmem>>, vector<4x128xf32>
      tpu.vector_store %arg6[%c0_11, %c0_12], %59 {strides = array<i32>} : memref<4x128xf32, #tpu.memory_space<vmem>>, vector<4x128xf32>,
    } else {
    }
    return
  }
  func.func @transform_0(%arg0: i32, %arg1: memref<5xf32, #tpu.memory_space<smem>>, %arg2: memref<5xf32, #tpu.memory_space<smem>>) -> (i32, i32) {
    %c0_i32 = arith.constant 0 : i32
    %c0_i32_0 = arith.constant 0 : i32
    %c0_i32_1 = arith.constant 0 : i32
    return %c0_i32, %c0_i32_0 : i32, i32
  }
  func.func @transform_1(%arg0: i32, %arg1: memref<5xf32, #tpu.memory_space<smem>>, %arg2: memref<5xf32, #tpu.memory_space<smem>>) -> (i32, i32, i32) {
    %c0_i32 = arith.constant 0 : i32
    %c0_i32_0 = arith.constant 0 : i32
    %c0_i32_1 = arith.constant 0 : i32
    return %arg0, %c0_i32, %c0_i32_0 : i32, i32, i32
  }
  func.func @transform_2(%arg0: i32, %arg1: memref<5xf32, #tpu.memory_space<smem>>, %arg2: memref<5xf32, #tpu.memory_space<smem>>) -> (i32, i32) {
    %c0_i32 = arith.constant 0 : i32
    %c0_i32_0 = arith.constant 0 : i32
    %c0_i32_1 = arith.constant 0 : i32
    return %c0_i32, %c0_i32_0 : i32, i32
  }
  func.func @transform_3(%arg0: i32, %arg1: memref<5xf32, #tpu.memory_space<smem>>, %arg2: memref<5xf32, #tpu.memory_space<smem>>) -> (i32, i32) {
    %c0_i32 = arith.constant 0 : i32
    %c0_i32_0 = arith.constant 0 : i32
    %c0_i32_1 = arith.constant 0 : i32
    return %c0_i32, %c0_i32_0 : i32, i32
  }
}

</mosaic_0001>

<bundles_post_ra>
// kernel: tpu_custom_call.1
= control target key start
LH: loop header
LB: loop body
LE: loop exit
PB: predicated region body
PF: predicated region fallthrough
CT: control target
= control target key end

     0   :  { %s749_s24 = smov [#allocation3]   ;;  %s750_s25 = smov [#allocation4]   ;;  %s959_s0 = inlined_call_operand.hbm [shape: f32[5], index: 0, kind: input, shape index: {}]   ;;  %s960_s2 = inlined_call_operand.hbm [shape: f32[4,128], index: 2, kind: input, shape index: {}]   ;;  %s961_s3 = inlined_call_operand.hbm [shape: f32[4,4,128], index: 3, kind: input, shape index: {}]   ;;  %s962_s4 = inlined_call_operand.hbm [shape: f32[4,5], index: 4, kind: input, shape index: {}]   ;;  %s963_s5 = inlined_call_operand.hbm [shape: f32[4,128], index: 5, kind: output, shape index: {}]   ;;  %s964_s1 = inlined_call_operand.hbm [shape: f32[5], index: 1, kind: input, shape index: {}]  }
   0x1   :  { %s11_s20 = sshll.u32 %s959_s0, 4  ;;  %s16_s23 = sshll.u32 %s964_s1, 4  ;;  %s12_s20 = int_to_ptr.hbm [resolvable:$true] %s11_s20  ;;  %s17_s23 = int_to_ptr.hbm [resolvable:$true] %s16_s23 }
   0x2   :  { %14 = dma.hbm_to_smem %s12_s20, 16, %s749_s24, [#allocation2] }
   0x3   :  { %19 = dma.hbm_to_smem %s17_s23, 16, %s750_s25, [#allocation2] }
   0x4   :  { %715 = dma.done.wait [#allocation2], 32 }
   0x5   :  { %716 = vsyncadd [#allocation2], 4294967264 }
   0x6   :  { %22 = sfence }
   0x7   :  { %23 = vsyncpa [#allocation6], 0 }
   0x8   :  { %24 = vsyncpa [#allocation9], 0 }
   0x9   :  { %26 = vsyncpa [#allocation9 + $0x1], 0 }
   0xa   :  { %27 = vsyncpa [#allocation7], 0  ;;  %s796_s26 = smov 0   ;;  %s798_s0 = smov 0  }
   0xb   :  { %s800_s27 = smov 0   ;;  %s802_s1 = smov 0  }
   0xc LB: > { %s815_s28 = sadd.s32 4294967295, %s747_s1   ;;  %p74_p0 = scmp.ne.s32.totalorder %s739_s0, %s735_s26  ;;  %s747_s1 = sphi %s802_s1, %s971_s1   ;;  %s743_s27 = sphi %s800_s27, %s970_s27   ;;  %s739_s0 = sphi %s798_s0, %s969_s0   ;;  %s735_s26 = sphi %s796_s26, %s968_s26  }
   0xd   : > { %p75_p1 = scmp.eq.s32.totalorder %s815_s28, 0  ;;  %p448_p2 = scmp.ge.s32.totalorder %s747_s1, 1 }
   0xe   : > { %p127_p3 = scmp.lt.s32.totalorder %s747_s1, 5  ;;  %p449_p4 = scmp.ne.s32.totalorder %s815_s28, 0 }
   0xf   : > { %p824_p5 = por %p75_p1, %p74_p0  ;;  %s151_s7 = sshll.u32 %s962_s4, 4  ;;  %s152_s7 = int_to_ptr.hbm [resolvable:$true] %s151_s7 }
  0x10   : > { %p831_p6 = pnand %p448_p2, %p127_p3  ;;  %s751_s9 = smov [#allocation10]  }
  0x11   : > { %s153_s10 = sshll.u32 %s751_s9, 4  ;;  %s139_s13 = sshll.u32 %s960_s2, 4  ;;  %s154_s10 = int_to_ptr.vmem [resolvable:$true] %s153_s10  ;;  %s140_s13 = int_to_ptr.hbm [resolvable:$true] %s139_s13 }
  0x12   : > { %p479_p7 = pneg %p831_p6  ;;  %s752_s14 = smov [#allocation5]  }
  0x13   : > { %s141_s15 = sshll.u32 %s752_s14, 4  ;;  %s843_s16 = sadd.s32 1, %s747_s1   ;;  %s142_s15 = int_to_ptr.vmem [resolvable:$true] %s141_s15 }
  0x14   : > { %p480_p8 = pnand %p479_p7, %p75_p1  ;;  %s61_s17 = sadd.s32 1, %s743_s27 }
  0x15   : > { %s58_s18 = ssub.s32 %s747_s1, %s843_s16  ;;  %p68_p9 = scmp.ne.s32.totalorder %s743_s27, %s739_s0 }
  0x16   : > { %485 = dma.hbm_to_vmem [thread:$0]  (!%p480_p8), %s152_s7, 64, %s154_s10, [#allocation9]  }
  0x17   : > { %482 = dma.hbm_to_vmem [thread:$0]  (!%p480_p8), %s140_s13, 64, %s142_s15, [#allocation6]  }
  0x18   : > { %p59_p10 = scmp.eq.s32.totalorder %s58_s18, 0  ;;  %p69_p11 = scmp.eq.s32.totalorder %s747_s1, 0 }
  0x19   : > { %p492_p12 = scmp.lt.s32.totalorder %s747_s1, 4  ;;  %s164_s19 = sand.u32 1, %s747_s1  }
  0x1a   : > { %s854_s20 = scalar_select %p59_p10, %s743_s27, %s61_s17  }
  0x1b   : > { %p70_p13 = por %p69_p11, %p68_p9  ;;  %s166_s21 = sand.u32 1, %s743_s27  }
  0x1c   : > { %s453_s22 = sshll.u32 %s747_s1, 2  ;;  %s452_s23 = sshll.u32 %s166_s21, 2 }
  0x1d   : > { %s172_s26 = scalar_lea.hbm %s961_s3, %s453_s22  ;;  %s168_s6 = scalar_lea.vmem [#allocation8], %s452_s23 }
  0x1e   : > { %s174_s30 = sshll.u32 %s172_s26, 4  ;;  %s176_s7 = sshll.u32 %s168_s6, 4  ;;  %s175_s30 = int_to_ptr.hbm [resolvable:$true] %s174_s30  ;;  %s177_s7 = int_to_ptr.vmem [resolvable:$true] %s176_s7 }
  0x1f   : > { %p863_p0 = pnand %p492_p12, %p70_p13  ;;  %s165_s10 = scalar_lea.sflag [#allocation9], %s164_s19 }
  0x20   : > { %s641_s11 = sshra.s32 %s175_s30, 4  ;;  %s648_s15 = scalar_lea.hbm %s961_s3, 16  ;;  %s642_s11 = int_to_ptr.hbm [resolvable:$true] %s641_s11 }
  0x21   : > { %s643_s12 = scalar_lea.hbm %s642_s11, 4  ;;  %p645_p3 = pneg %p863_p0 }
  0x22   : > { %p644_p2 = scmp.ne.s32.totalorder %s642_s11, %s643_s12  ;;  %p649_p9 = scmp.lt.s32.totalorder %s642_s11, %s961_s3 }
  0x23   : > { %p650_p10 = scmp.lt.s32.totalorder %s648_s15, %s643_s12 }
  0x24   : > { %p646_p7 = pnand %p645_p3, %p644_p2 }
  0x25   : > { %p651_p11 = por %p650_p10, %p649_p9 }
  0x26   : > { %p647_p8 = pneg %p646_p7 }
  0x28   : > { %p652_p12 = pnand %p651_p11, %p647_p8 }
  0x2a   : > { %655 = shalt.err (!%p652_p12)
}
  0x2b   : > { %489 = dma.hbm_to_vmem [thread:$0]  (!%p863_p0), %s175_s30, 64, %s177_s7, %s165_s10  }
  0x2c   : > { %185 = sbr.rel (%p831_p6) target bundleno = 260 (0x104), region = 32 }
  0x31   : > { %718 = dma.done.wait (%p75_p1), [#allocation6], 64  }
  0x32   : > { %720 = vsyncadd (%p75_p1), [#allocation6], 4294967232  ;;  %s192_s18 = sand.u32 1, %s815_s28   ;;  %s194_s19 = sand.u32 1, %s739_s0  }
  0x33   : > { %s885_s21 = sshll.u32 %s194_s19, 2  ;;  %s193_s22 = scalar_lea.sflag [#allocation9], %s192_s18 }
  0x34   : > { %s196_s23 = scalar_lea.vmem [#allocation8], %s885_s21 }
  0x35   : > { %722 = dma.done.wait (%p824_p5), %s193_s22, 64  }
  0x36   : > { %724 = vsyncadd (%p824_p5), %s193_s22, 4294967232 }
  0x37   : > { %726 = dma.done.wait (%p75_p1), [#allocation9], 64  }
  0x38   : > { %728 = vsyncadd (%p75_p1), [#allocation9], 4294967232  ;;  %223 = sbr.rel (%p449_p4) target bundleno = 66 (0x42), region = 48  ;;  %s224_s8 = sld [smem:[#allocation3]] (!%p449_p4) }
  0x3d   : > { %v225_v0 = vld [vmem:[#allocation5] sm:$0xf] }
  0x3e   : > { %v226_v1 = vstv %s224_s8 }
  0x3f   : > { %v227_v2 = vmul.f32 %v226_v1, %v225_v0 }
  0x41   : > { %228 = vst [vmem:[#allocation11] sm:$0xf] %v227_v2 }
  0x42 PF: > { %v898_v3 = vld [vmem:[#allocation10] sm:$0xf]  ;;  %v753_v4 = vmov 2   ;;  %v754_v5 = vmov 0   ;;  %s901_s29 = sld [smem:[#allocation3 + %s815_s28]]  ;;  %s230_s24 = sadd.s32 1, %s815_s28 }
  0x43   : > { %542 = vset.pattern.permute.xlu1 %v753_v4  ;;  %540 = vset.pattern.permute.xlu0 %v754_v5  ;;  %s232_s25 = sld [smem:[#allocation4 + %s815_s28]]  ;;  %v755_v6 = vmov 4   ;;  %v756_v7 = vmov 3   ;;  %v757_v8 = vmov 1   ;;  %v254_v22 = vld [vmem:[%s196_s23] sm:$0xf] }
  0x44   : > { %273 = vperm.xlu1 %542, %v898_v3   ;;  %260 = vperm.xlu0 %540, %v898_v3   ;;  %s907_s26 = sld [smem:[#allocation3 + %s230_s24]] }
  0x45   : > { %544 = vset.pattern.permute.xlu2 %v755_v6 }
  0x48   : > { %s238_s7 = smul.f32 %s901_s29, %s901_s29  ;;  %v236_v25 = vld [vmem:[#allocation11] sm:$0xf] }
  0x49   : > { %s233_s30 = smul.f32 %s232_s25, %s901_s29 }
  0x4a   : > { %p315_p1 = scmp.ne.f32.partialorder %s907_s26, 0.0 }
  0x4b   : > { %s912_s6 = sadd.f32 %s233_s30, %s901_s29  ;;  %v330_v60 = vstv (%p315_p1), %s907_s26  ;;  %v758_v61 = vmov (%p315_p1), 4  }
  0x4c   : > { %543 = vset.pattern.permute.xlu1 %v756_v7  ;;  %541 = vset.pattern.permute.xlu0 %v757_v8  ;;  %v331_v62 = vadd.f32 (%p315_p1), %v330_v60, %v898_v3  ;;  %vm345_vm6 = vweird.f32 (%p315_p1), %v330_v60 }
  0x4d   : > { %280 = vperm.xlu1 %543, %v898_v3   ;;  %266 = vperm.xlu0 %541, %v898_v3   ;;  %v286_v9 = vstv %s912_s6  ;;  %s237_s9 = smul.f32 %s912_s6, %s912_s6  ;;  %s311_s12 = ssub.f32 %s907_s26, %s912_s6 }
  0x4e   : > { %v287_v10 = vadd.f32 %v286_v9, %v898_v3  ;;  %vm301_vm2 = vweird.f32 %v286_v9  ;;  %v307_v47 = vand.u32 2147483648, %v286_v9  ;;  %v305_v50 = vand.u32 2147483647, %v286_v9  ;;  %s355_s13 = ssub.f32 (%p315_p1), %s901_s29, %s912_s6 }
  0x4f   : > { %s239_s10 = ssub.f32 %s237_s9, %s238_s7  ;;  %v312_v56 = vstv %s311_s12 }
  0x50   : > { %290 = vperm.xlu2 %544, %v287_v10   ;;  %v308_v51 = vor.u32 1.1754944e-38, %v307_v47  ;;  %vm306_vm5 = vcmp.eq.f32.partialorder %v305_v50, 8.507059e+37  ;;  %s356_s14 = smul.f32 (%p315_p1), 0.5, %s355_s13 }
  0x51   : > { %v240_v11 = vstv %s239_s10 }
  0x52   : > { %546 = vrsqrt.f32 %v240_v11  ;;  %vm248_vm0 = vcmp.eq.f32.partialorder %v240_v11, inf  ;;  %v251_v18 = vand.u32 2147483648, %v240_v11  ;;  %vm250_vm1 = vcmp.eq.f32.partialorder %v240_v11, 0.0 }
  0x53   : > { %548 = vrcp.f32 %v286_v9 }
  0x55   : > { %545 = vset.pattern.permute.xlu0 %v755_v6 }
  0x56   : > { %552 = vset.pattern.permute.xlu0 (%p315_p1), %v758_v61 }
  0x57   : > { %334 = vperm.xlu0 (%p315_p1), %552, %v331_v62  }
  0x58   : > { %v547_v12 = vpop.eup %546 }
  0x59   : > { %v242_v13 = vmul.f32 %v547_v12, %v240_v11  ;;  %v549_v29 = vpop.eup %548 }
  0x5a   : > { %v297_v32 = vmul.f32 %v549_v29, %v286_v9  ;;  %vm302_vm3 = vweird.f32 %v549_v29 }
  0x5b   : > { %v243_v14 = vmul.f32 %v547_v12, %v242_v13  ;;  %vm303_vm4 = vmor %vm301_vm2, %vm302_vm3 }
  0x5c   : > { %v298_v38 = vsub.f32 1.0, %v297_v32 }
  0x5d   : > { %v244_v15 = vmul.f32 0.5, %v243_v14 }
  0x5e   : > { %v299_v44 = vmul.f32 %v549_v29, %v298_v38 }
  0x5f   : > { %v245_v16 = vsub.f32 1.5, %v244_v15  ;;  %v351_v15 = vand.u32 (%p315_p1), 2147483648, %v330_v60 }
  0x60   : > { %v300_v49 = vadd.f32 %v549_v29, %v299_v44 }
  0x61   : > { %v246_v17 = vmul.f32 %v547_v12, %v245_v16 }
  0x62   : > { %v304_v52 = vsel %vm303_vm4, %v549_v29, %v300_v49 }
  0x63   : > { %v247_v19 = vmul.f32 %v246_v17, %v240_v11  ;;  %v309_v54 = vsel %vm306_vm5, %v308_v51, %v304_v52 }
  0x65   : > { %v249_v20 = vsel %vm248_vm0, %v240_v11, %v247_v19  ;;  %v352_v19 = vor.u32 (%p315_p1), 1.1754944e-38, %v351_v15 }
  0x66   : > { %v252_v21 = vsel %vm250_vm1, %v251_v18, %v249_v20  ;;  %v349_v18 = vand.u32 (%p315_p1), 2147483647, %v330_v60 }
  0x67   : > { %463 = vpush %v252_v21 }
  0x68   : > { %vm350_vm9 = vcmp.eq.f32.partialorder (%p315_p1), %v349_v18, 8.507059e+37 }
  0x98   : > { %s464_s11 = spop %463 }
  0x99   : > { %v255_v23 = vstv %s464_s11 }
  0x9a   : > { %v256_v24 = vmul.f32 %v255_v23, %v254_v22 }
  0x9c   : > { %v924_v28 = vadd.f32 %v256_v24, %v236_v25  ;;  %v358_v25 = vstv (%p315_p1), %s356_s14 }
  0x9e   : > { %v263_v30 = vperm.slane %v924_v28, 0  ;;  %v269_v31 = vperm.slane %v924_v28, 1  ;;  %v276_v33 = vperm.slane %v924_v28, 2  ;;  %v283_v36 = vperm.slane %v924_v28, 3 }
  0xaa   : > { %v291_v45 = vpop.permute.xlu2 %290 }
  0xb6   : > { %v261_v26 = vpop.permute.xlu0 %260  ;;  %v274_v27 = vpop.permute.xlu1 %273 }
  0xb7   : > { %v264_v35 = vmul.f32 %v263_v30, %v261_v26  ;;  %v277_v40 = vmul.f32 %v276_v33, %v274_v27 }
  0xbf   : > { %v267_v34 = vpop.permute.xlu0 %266  ;;  %v281_v39 = vpop.permute.xlu1 %280 }
  0xc0   : > { %v270_v37 = vmul.f32 %v269_v31, %v267_v34  ;;  %v284_v42 = vmul.f32 %v283_v36, %v281_v39 }
  0xc2   : > { %v271_v41 = vadd.f32 %v270_v37, %v264_v35 }
  0xc4   : > { %v278_v43 = vadd.f32 %v277_v40, %v271_v41 }
  0xc6   : > { %v285_v46 = vadd.f32 %v284_v42, %v278_v43 }
  0xc8   : > { %v293_v48 = vadd.f32 %v291_v45, %v285_v46 }
  0xc9   : > { %v335_v3 = vpop.permute.xlu0 (%p315_p1), %334 }
  0xca   : > { %550 = vtanh.f32 %v293_v48 }
  0xcb   : > { %553 = vrcp.f32 (%p315_p1), %v330_v60 }
  0xd0   : > { %v551_v53 = vpop.eup %550 }
  0xd1   : > { %v295_v55 = vsub.f32 %v924_v28, %v551_v53  ;;  %v554_v5 = vpop.eup (%p315_p1), %553 }
  0xd2   : > { %v341_v9 = vmul.f32 (%p315_p1), %v554_v5, %v330_v60  ;;  %vm346_vm7 = vweird.f32 (%p315_p1), %v554_v5 }
  0xd3   : > { %v310_v57 = vmul.f32 %v309_v54, %v295_v55  ;;  %318 = sbr.rel (!%p315_p1) target bundleno = 247 (0xf7), region = 52  ;;  %vm347_vm8 = vmor (%p315_p1), %vm345_vm6, %vm346_vm7 }
  0xd4   : > { %v342_v12 = vsub.f32 (%p315_p1), 1.0, %v341_v9 }
  0xd5   : > { %v313_v58 = vmul.f32 %v312_v56, %v310_v57 }
  0xd6   : > { %v343_v14 = vmul.f32 (%p315_p1), %v554_v5, %v342_v12 }
  0xd7   : > { %v314_v59 = vadd.f32 %v313_v58, %v924_v28 }
  0xd8   : > { %v344_v17 = vadd.f32 %v554_v5, %v343_v14 }
  0xd9   : > { %v319_v63 = vperm.slane %v314_v59, 0  ;;  %v321_v0 = vperm.slane %v314_v59, 1  ;;  %v324_v4 = vperm.slane %v314_v59, 2  ;;  %v327_v8 = vperm.slane %v314_v59, 3 }
  0xda   : > { %v348_v20 = vsel %vm347_vm8, %v554_v5, %v344_v17 }
  0xdb   : > { %v320_v1 = vmul.f32 %v319_v63, %v261_v26  ;;  %v322_v2 = vmul.f32 %v321_v0, %v267_v34  ;;  %v325_v7 = vmul.f32 %v324_v4, %v274_v27  ;;  %v328_v11 = vmul.f32 %v327_v8, %v281_v39 }
  0xdc   : > { %v353_v22 = vsel %vm350_vm9, %v352_v19, %v348_v20 }
  0xdd   : > { %v323_v6 = vadd.f32 %v322_v2, %v320_v1 }
  0xdf   : > { %v326_v10 = vadd.f32 %v325_v7, %v323_v6 }
  0xe1   : > { %v329_v13 = vadd.f32 %v328_v11, %v326_v10 }
  0xe3   : > { %v337_v16 = vadd.f32 %v335_v3, %v329_v13 }
  0xe5   : > { %555 = vtanh.f32 %v337_v16 }
  0xeb   : > { %v556_v21 = vpop.eup %555 }
  0xec   : > { %v339_v23 = vsub.f32 %v314_v59, %v556_v21 }
  0xee   : > { %v354_v24 = vmul.f32 %v353_v22, %v339_v23 }
  0xf0   : > { %v357_v26 = vadd.f32 %v354_v24, %v310_v57 }
  0xf2   : > { %v359_v27 = vmul.f32 %v358_v25, %v357_v26 }
  0xf4   : > { %v360_v29 = vadd.f32 %v359_v27, %v924_v28 }
  0xf6   : > { %361 = vst [vmem:[#allocation11] sm:$0xf] %v360_v29 }
  0xf7 PF: > { %p362_p4 = scmp.eq.f32.partialorder %s907_s26, 0.0 }
  0xf8   : > { %366 = vst [vmem:[#allocation11] sm:$0xf] (%p362_p4), %v314_v59 }
  0xf9   : > { %365 = sbr.rel (!%p362_p4) target bundleno = 254 (0xfe), region = 56 }
  0xfe PF: > { %p495_p5 = scmp.eq.s32.totalorder %s815_s28, 3  ;;  %s375_s1 = sshll.u32 %s963_s5, 4  ;;  %s376_s1 = int_to_ptr.hbm [resolvable:$true] %s375_s1 }
  0xff   : > { %s759_s18 = smov [#allocation11]  }
 0x100   : > { %s373_s19 = sshll.u32 %s759_s18, 4  ;;  %s374_s19 = int_to_ptr.vmem [resolvable:$true] %s373_s19 }
 0x101   : > { %476 = dma.vmem_to_hbm [thread:$0]  (%p495_p5), %s374_s19, 64, %s376_s1, [#allocation7]  }
 0x102   : > { %730 = dma.done.wait (%p495_p5), [#allocation7], 64  }
 0x103   : > { %732 = vsyncadd (%p495_p5), [#allocation7], 4294967232 }
 0x104 PF: > { %p30_p6 = scmp.ge.s32.totalorder %s843_s16, 6   ;;  %s968_s26 = smov %s739_s0 }
 0x105   : > { %s969_s0 = smov %s743_s27  ;;  %s970_s27 = smov %s854_s20 }
 0x106   : > { %s971_s1 = smov %s843_s16  ;;  %32 = sbr.rel (!%p30_p6) target bundleno = 12 (0xc), region = 90 }
 0x10b   :  { %389 = vsyncpa [#allocation6], 1 }
 0x10c   :  { %391 = vsyncpa [#allocation6 + $0x1], 1 }
 0x10d   :  { %392 = vsyncpa [#allocation9], 1 }
 0x10e   :  { %394 = vsyncpa [#allocation9 + $0x1], 1 }
 0x10f   :  { %395 = vsyncpa [#allocation7], 1 }
 0x110   :  { %397 = vsyncpa [#allocation7 + $0x1], 1 }

</bundles_post_ra>
